<compile_context>
chip_gen: v7x
topology: tpu7x:2x2x1
jax: 0.10.0
libtpu: 0.0.40
codegen_flags: <defaults>
</compile_context>

<pallas_src>
import functools

import numpy as np
import jax
import jax.numpy as jnp
from jax.experimental import pallas as pl
from jax.experimental.pallas import tpu as pltpu


# ----------------------------------------------------------------------------
# Host-side glue: bicubic interpolation matrices (PyTorch semantics), cached.
# ----------------------------------------------------------------------------
def _cubic1(t, a):
    # |t| <= 1 branch of the cubic convolution kernel
    return ((a + 2.0) * t - (a + 3.0)) * t * t + 1.0


def _cubic2(t, a):
    # 1 < |t| < 2 branch
    return ((a * t - 5.0 * a) * t + 8.0 * a) * t - 4.0 * a


def build_bicubic_matrix(in_size: int, out_size: int, a: float = -0.75) -> np.ndarray:
    """M[out, in] such that y = M @ x reproduces torch F.interpolate
    (mode='bicubic', align_corners=False) along one axis."""
    M = np.zeros((out_size, in_size), dtype=np.float64)
    scale = in_size / out_size
    for o in range(out_size):
        src = (o + 0.5) * scale - 0.5          # align_corners=False source coord
        i0 = int(np.floor(src))
        t = src - i0
        w = (_cubic2(t + 1.0, a), _cubic1(t, a), _cubic1(1.0 - t, a), _cubic2(2.0 - t, a))
        for k in range(4):
            idx = min(max(i0 - 1 + k, 0), in_size - 1)   # border index clamping
            M[o, idx] += w[k]
    return M.astype(np.float32)


@functools.lru_cache(maxsize=None)
def _interp_matrices(h: int, w: int, upscale: int):
    """Device-resident (A_h, A_w) for a given geometry (cached across calls)."""
    a_h = jnp.asarray(build_bicubic_matrix(h, h * upscale))        # (H_out, H)
    a_w = jnp.asarray(build_bicubic_matrix(w, w * upscale).T)      # (W, W_out)
    return a_h, a_w


# ----------------------------------------------------------------------------
# VMEM-aware row-stripe sizing.
# ----------------------------------------------------------------------------
def _vmem_capacity_bytes() -> int:
    """Physical VMEM per core (v5e/v6e 128 MiB, v7x 64 MiB); safe fallback."""
    try:
        return int(pltpu.get_tpu_info().vmem_capacity_bytes)
    except Exception:
        return 64 << 20


def _pick_row_tile(h_out: int, h: int, w: int, w_out: int, c: int,
                   budget_bytes: int, prefer_two_stripes: bool) -> int:
    """Largest 8-aligned divisor of h_out whose blocks fit the VMEM budget."""
    f32 = 4
    # Blocks that do not scale with tile_ho (double-buffered by the pipeline).
    fixed = 2 * c * h * w * f32            # x block   (C, H, W)
    fixed += 2 * w * w_out * f32           # A_w block (W, W_out), constant
    # Per-output-row cost.
    per_row = 2 * h * f32                  # A_h block rows
    per_row += 2 * c * w_out * f32         # output block rows
    per_row += 2 * (w + w_out) * f32       # f32 temporaries inside the kernel (slack)
    avail = budget_bytes - fixed
    max_rows = max(8, avail // per_row) if avail > 0 else 8

    if h_out % 8 != 0:
        # Cannot form 8-aligned stripes; use one full stripe (block == extent).
        # TODO(synk): masked boundary stripes for odd input heights at very
        # large images (only a VMEM-pressure concern, not a correctness one).
        return h_out

    cap = min(int(max_rows), h_out)
    if prefer_two_stripes and h_out >= 16:
        half = (h_out // 2) // 8 * 8        # >=2 stripes keeps both v7x TCs busy
        if half >= 8:
            cap = min(cap, half)
    cap = max(8, cap - cap % 8)
    for t in range(cap, 7, -8):             # largest multiple-of-8 divisor <= cap
        if h_out % t == 0:
            return t
    return h_out


# ----------------------------------------------------------------------------
# Pallas kernel: one (batch, row-stripe) step -> NCHW (C, tile_Ho, W_out) block.
# ----------------------------------------------------------------------------
def _make_bicubic_kernel(num_channels: int):
    def kernel(ah_ref, aw_ref, x_ref, o_ref):
        # ah: (tile_Ho, H)    row-interpolation stripe
        # aw: (W, W_out)      column-interpolation matrix (per channel)
        # x:  (C, H, W)       native NCHW input block for this image
        # o:  (C, tile_Ho, W_out)  NCHW output block (lane-dense per channel)
        ah = ah_ref[...]
        aw = aw_ref[...]
        for ci in range(num_channels):       # static unroll, C is small
            tmp = jnp.dot(ah, x_ref[ci], preferred_element_type=jnp.float32)
            out = jnp.dot(tmp, aw, preferred_element_type=jnp.float32)
            o_ref[ci] = jnp.clip(out, 0.0, 1.0).astype(o_ref.dtype)
    return kernel


def basic_sr_forward(x: jax.Array, upscale: int = 4) -> jax.Array:
    """BasicSR.forward: bicubic upsample by `upscale`, then clamp to [0, 1].

    x: (B, C, H, W) float32, NCHW.
    returns: (B, C, H*upscale, W*upscale) float32, NCHW.
    """
    b, c, h, w = x.shape
    h_out, w_out = h * upscale, w * upscale

    a_h, a_w = _interp_matrices(h, w, upscale)      # (H_out, H), (W, W_out)

    # VMEM-aware stripe sizing + explicit scoped-VMEM limit.
    capacity = _vmem_capacity_bytes()
    vmem_limit = min((capacity * 3) // 4, 96 << 20)     # headroom for Mosaic scratch
    block_budget = vmem_limit - (2 << 20)
    tile_ho = _pick_row_tile(h_out, h, w, w_out, c, block_budget,
                             prefer_two_stripes=(b == 1))
    n_stripes = h_out // tile_ho

    out = pl.pallas_call(
        _make_bicubic_kernel(c),
        out_shape=jax.ShapeDtypeStruct((b, c, h_out, w_out), x.dtype),
        grid_spec=pltpu.PrefetchScalarGridSpec(
            num_scalar_prefetch=0,
            grid=(b, n_stripes),
            in_specs=[
                # A_h row stripe: depends only on the stripe index.
                pl.BlockSpec((tile_ho, h), lambda bi, si: (si, 0)),
                # A_w: constant across the whole grid.
                pl.BlockSpec((w, w_out), lambda bi, si: (0, 0)),
                # Native NCHW input, one full image (all channels) per step.
                pl.BlockSpec((None, c, h, w), lambda bi, si: (bi, 0, 0, 0)),
            ],
            # Native NCHW output written directly (no wrapper transpose).
            out_specs=pl.BlockSpec(
                (None, c, tile_ho, w_out), lambda bi, si: (bi, 0, si, 0)
            ),
        ),
        compiler_params=pltpu.CompilerParams(
            dimension_semantics=("parallel", "parallel"),
            vmem_limit_bytes=int(vmem_limit),
        ),
    )(a_h, a_w, x)

    return out


if __name__ == "__main__":
    key = jax.random.PRNGKey(0)
    # Shapes consistent with the module: B=2, C=3 (in_chans default), 16x16 -> 64x64.
    x = jax.random.uniform(key, (2, 3, 16, 16), dtype=jnp.float32)

    out = jax.block_until_ready(basic_sr_forward(x, upscale=4))
    assert out.shape == (2, 3, 64, 64), out.shape

    # Float64 host reference of the same separable bicubic (PyTorch semantics).
    x64 = np.asarray(x, dtype=np.float64)
    a_h64 = build_bicubic_matrix(16, 64).astype(np.float64)
    a_w64 = build_bicubic_matrix(16, 64).astype(np.float64).T
    ref = np.clip(np.einsum("oh,bchw,wx->bcox", a_h64, x64, a_w64), 0.0, 1.0)
    np.testing.assert_allclose(np.asarray(out), ref, atol=1e-4, rtol=1e-4)

    print("KERNEL_OK")
</pallas_src>

<mosaic_0001>
module attributes {stable_mosaic.version = 11 : i64} {
  func.func @kernel(%arg0: i32, %arg1: i32, %arg2: memref<64x16xf32, #tpu.memory_space<vmem>>, %arg3: memref<16x64xf32, #tpu.memory_space<vmem>>, %arg4: memref<1x3x16x16xf32, #tpu.memory_space<vmem>>, %arg5: memref<1x3x64x64xf32, #tpu.memory_space<vmem>>) attributes {dimension_semantics = [#tpu.dimension_semantics<parallel>, #tpu.dimension_semantics<parallel>], iteration_bounds = array<i64: 2, 1>, scalar_prefetch = 0 : i64, scratch_operands = 0 : i64, tpu.core_type = #tpu.core_type<tc>, window_params = [{transform_indices = @transform_0, window_bounds = array<i64: 64, 16>}, {pipeline_mode = #tpu.pipeline_mode<synchronous>, transform_indices = @transform_1, window_bounds = array<i64: 16, 64>}, {transform_indices = @transform_2, window_bounds = array<i64: 1, 3, 16, 16>}, {transform_indices = @transform_3, window_bounds = array<i64: 1, 3, 64, 64>}]} {
    %c0 = arith.constant 0 : index
    %c0_0 = arith.constant 0 : index
    %0 = vector.load %arg2[%c0, %c0_0] : memref<64x16xf32, #tpu.memory_space<vmem>>, vector<64x16xf32>
    %c0_1 = arith.constant 0 : index
    %c0_2 = arith.constant 0 : index
    %1 = vector.load %arg3[%c0_1, %c0_2] : memref<16x64xf32, #tpu.memory_space<vmem>>, vector<16x64xf32>
    %c0_3 = arith.constant 0 : index
    %c0_4 = arith.constant 0 : index
    %c0_5 = arith.constant 0 : index
    %c0_6 = arith.constant 0 : index
    %2 = vector.load %arg4[%c0_3, %c0_4, %c0_5, %c0_6] : memref<1x3x16x16xf32, #tpu.memory_space<vmem>>, vector<1x1x16x16xf32>
    %3 = vector.shape_cast %2 : vector<1x1x16x16xf32> to vector<16x16xf32>
    %cst = arith.constant dense<0.000000e+00> : vector<64x16xf32>
    %4 = tpu.matmul %0, %3, %cst {dimension_numbers = #tpu.dot_dimension_numbers<[1], [0], [0], [1], [0, 0, 1, 1], [], []>} : vector<64x16xf32>, vector<16x16xf32>, vector<64x16xf32> -> vector<64x16xf32>
    %cst_7 = arith.constant dense<0.000000e+00> : vector<64x64xf32>
    %5 = tpu.matmul %4, %1, %cst_7 {dimension_numbers = #tpu.dot_dimension_numbers<[1], [0], [0], [1], [0, 0, 1, 1], [], []>} : vector<64x16xf32>, vector<16x64xf32>, vector<64x64xf32> -> vector<64x64xf32>
    %cst_8 = arith.constant 0.000000e+00 : f32
    %cst_9 = arith.constant 1.000000e+00 : f32
    %6 = vector.broadcast %cst_8 : f32 to vector<64x64xf32>
    %7 = arith.maximumf %6, %5 : vector<64x64xf32>
    %8 = vector.broadcast %cst_9 : f32 to vector<64x64xf32>
    %9 = arith.minimumf %8, %7 : vector<64x64xf32>
    %c0_10 = arith.constant 0 : index
    %c0_11 = arith.constant 0 : index
    %c0_12 = arith.constant 0 : index
    %c0_13 = arith.constant 0 : index
    %10 = vector.load %arg5[%c0_10, %c0_11, %c0_12, %c0_13] : memref<1x3x64x64xf32, #tpu.memory_space<vmem>>, vector<1x1x64x64xf32>
    %11 = vector.shape_cast %10 : vector<1x1x64x64xf32> to vector<64x64xf32>
    %12 = vector.shape_cast %9 : vector<64x64xf32> to vector<1x1x64x64xf32>
    tpu.vector_store %arg5[%c0_10, %c0_11, %c0_12, %c0_13], %12 {strides = array<i32>} : memref<1x3x64x64xf32, #tpu.memory_space<vmem>>, vector<1x1x64x64xf32>,
    %c0_14 = arith.constant 0 : index
    %c1 = arith.constant 1 : index
    %c0_15 = arith.constant 0 : index
    %c0_16 = arith.constant 0 : index
    %13 = vector.load %arg4[%c0_14, %c1, %c0_15, %c0_16] : memref<1x3x16x16xf32, #tpu.memory_space<vmem>>, vector<1x1x16x16xf32>
    %14 = vector.shape_cast %13 : vector<1x1x16x16xf32> to vector<16x16xf32>
    %cst_17 = arith.constant dense<0.000000e+00> : vector<64x16xf32>
    %15 = tpu.matmul %0, %14, %cst_17 {dimension_numbers = #tpu.dot_dimension_numbers<[1], [0], [0], [1], [0, 0, 1, 1], [], []>} : vector<64x16xf32>, vector<16x16xf32>, vector<64x16xf32> -> vector<64x16xf32>
    %cst_18 = arith.constant dense<0.000000e+00> : vector<64x64xf32>
    %16 = tpu.matmul %15, %1, %cst_18 {dimension_numbers = #tpu.dot_dimension_numbers<[1], [0], [0], [1], [0, 0, 1, 1], [], []>} : vector<64x16xf32>, vector<16x64xf32>, vector<64x64xf32> -> vector<64x64xf32>
    %cst_19 = arith.constant 0.000000e+00 : f32
    %cst_20 = arith.constant 1.000000e+00 : f32
    %17 = vector.broadcast %cst_19 : f32 to vector<64x64xf32>
    %18 = arith.maximumf %17, %16 : vector<64x64xf32>
    %19 = vector.broadcast %cst_20 : f32 to vector<64x64xf32>
    %20 = arith.minimumf %19, %18 : vector<64x64xf32>
    %c0_21 = arith.constant 0 : index
    %c1_22 = arith.constant 1 : index
    %c0_23 = arith.constant 0 : index
    %c0_24 = arith.constant 0 : index
    %21 = vector.load %arg5[%c0_21, %c1_22, %c0_23, %c0_24] : memref<1x3x64x64xf32, #tpu.memory_space<vmem>>, vector<1x1x64x64xf32>
    %22 = vector.shape_cast %21 : vector<1x1x64x64xf32> to vector<64x64xf32>
    %23 = vector.shape_cast %20 : vector<64x64xf32> to vector<1x1x64x64xf32>
    tpu.vector_store %arg5[%c0_21, %c1_22, %c0_23, %c0_24], %23 {strides = array<i32>} : memref<1x3x64x64xf32, #tpu.memory_space<vmem>>, vector<1x1x64x64xf32>,
    %c0_25 = arith.constant 0 : index
    %c2 = arith.constant 2 : index
    %c0_26 = arith.constant 0 : index
    %c0_27 = arith.constant 0 : index
    %24 = vector.load %arg4[%c0_25, %c2, %c0_26, %c0_27] : memref<1x3x16x16xf32, #tpu.memory_space<vmem>>, vector<1x1x16x16xf32>
    %25 = vector.shape_cast %24 : vector<1x1x16x16xf32> to vector<16x16xf32>
    %cst_28 = arith.constant dense<0.000000e+00> : vector<64x16xf32>
    %26 = tpu.matmul %0, %25, %cst_28 {dimension_numbers = #tpu.dot_dimension_numbers<[1], [0], [0], [1], [0, 0, 1, 1], [], []>} : vector<64x16xf32>, vector<16x16xf32>, vector<64x16xf32> -> vector<64x16xf32>
    %cst_29 = arith.constant dense<0.000000e+00> : vector<64x64xf32>
    %27 = tpu.matmul %26, %1, %cst_29 {dimension_numbers = #tpu.dot_dimension_numbers<[1], [0], [0], [1], [0, 0, 1, 1], [], []>} : vector<64x16xf32>, vector<16x64xf32>, vector<64x64xf32> -> vector<64x64xf32>
    %cst_30 = arith.constant 0.000000e+00 : f32
    %cst_31 = arith.constant 1.000000e+00 : f32
    %28 = vector.broadcast %cst_30 : f32 to vector<64x64xf32>
    %29 = arith.maximumf %28, %27 : vector<64x64xf32>
    %30 = vector.broadcast %cst_31 : f32 to vector<64x64xf32>
    %31 = arith.minimumf %30, %29 : vector<64x64xf32>
    %c0_32 = arith.constant 0 : index
    %c2_33 = arith.constant 2 : index
    %c0_34 = arith.constant 0 : index
    %c0_35 = arith.constant 0 : index
    %32 = vector.load %arg5[%c0_32, %c2_33, %c0_34, %c0_35] : memref<1x3x64x64xf32, #tpu.memory_space<vmem>>, vector<1x1x64x64xf32>
    %33 = vector.shape_cast %32 : vector<1x1x64x64xf32> to vector<64x64xf32>
    %34 = vector.shape_cast %31 : vector<64x64xf32> to vector<1x1x64x64xf32>
    tpu.vector_store %arg5[%c0_32, %c2_33, %c0_34, %c0_35], %34 {strides = array<i32>} : memref<1x3x64x64xf32, #tpu.memory_space<vmem>>, vector<1x1x64x64xf32>,
    return
  }
  func.func @transform_0(%arg0: i32, %arg1: i32) -> (i32, i32) {
    %c0_i32 = arith.constant 0 : i32
    %c0_i32_0 = arith.constant 0 : i32
    return %arg1, %c0_i32 : i32, i32
  }
  func.func @transform_1(%arg0: i32, %arg1: i32) -> (i32, i32) {
    %c0_i32 = arith.constant 0 : i32
    %c0_i32_0 = arith.constant 0 : i32
    %c0_i32_1 = arith.constant 0 : i32
    return %c0_i32, %c0_i32_0 : i32, i32
  }
  func.func @transform_2(%arg0: i32, %arg1: i32) -> (i32, i32, i32, i32) {
    %c0_i32 = arith.constant 0 : i32
    %c0_i32_0 = arith.constant 0 : i32
    %c0_i32_1 = arith.constant 0 : i32
    %c0_i32_2 = arith.constant 0 : i32
    return %arg0, %c0_i32, %c0_i32_0, %c0_i32_1 : i32, i32, i32, i32
  }
  func.func @transform_3(%arg0: i32, %arg1: i32) -> (i32, i32, i32, i32) {
    %c0_i32 = arith.constant 0 : i32
    %c0_i32_0 = arith.constant 0 : i32
    %c0_i32_1 = arith.constant 0 : i32
    return %arg0, %c0_i32, %arg1, %c0_i32_0 : i32, i32, i32, i32
  }
}

</mosaic_0001>

<bundles_post_ra>
// kernel: tpu_custom_call.1
= control target key start
LH: loop header
LB: loop body
LE: loop exit
PB: predicated region body
PF: predicated region fallthrough
CT: control target
= control target key end

     0   :  { %8 = vsyncpa [#allocation3], 0  ;;  %s1935_s0 = inlined_call_operand.vmem [shape: f32[64,16], index: 0, kind: input, shape index: {}]   ;;  %s1936_s1 = inlined_call_operand.vmem [shape: f32[16,64], index: 1, kind: input, shape index: {}]   ;;  %s1937_s2 = inlined_call_operand.hbm [shape: f32[2,3,16,16], index: 2, kind: input, shape index: {}]   ;;  %s1938_s3 = inlined_call_operand.hbm [shape: f32[2,3,64,64], index: 3, kind: output, shape index: {}]  }
   0x1   :  { %10 = vsyncpa [#allocation3 + $0x1], 0 }
   0x2   :  { %11 = vsyncpa [#allocation4], 0 }
   0x3   :  { %13 = vsyncpa [#allocation4 + $0x1], 0  ;;  %s1630_s12 = smov 0   ;;  %s1632_s13 = smov 0  }
   0x4   :  { %s1634_s14 = smov 0   ;;  %s1636_s15 = smov 0  }
   0x5   :  { %s1638_s16 = smov 0   ;;  %s1640_s17 = smov 0  }
   0x6 LB: > { %s1161_s18 = sadd.s32 4294967295, %s1602_s17   ;;  %s1162_s19 = sadd.s32 4294967294, %s1602_s17   ;;  %s1602_s17 = sphi %s1640_s17, %s19_s17   ;;  %s1598_s16 = sphi %s1638_s16, %s1953_s16   ;;  %s1594_s15 = sphi %s1636_s15, %s1952_s15   ;;  %s1590_s14 = sphi %s1634_s14, %s1951_s14   ;;  %s1586_s13 = sphi %s1632_s13, %s1950_s13   ;;  %s1582_s12 = sphi %s1630_s12, %s1949_s12  }
   0x7   : > { %s31_s20 = sadd.s32 1, %s1598_s16  ;;  %s85_s21 = sadd.s32 1, %s1590_s14 }
   0x8   : > { %p33_p0 = scmp.ge.s32.totalorder %s31_s20, 2  ;;  %p92_p1 = scmp.ne.s32.totalorder %s1590_s14, %s1586_s13 }
   0x9   : > { %p93_p2 = scmp.eq.s32.totalorder %s1602_s17, 0  ;;  %p98_p3 = scmp.ne.s32.totalorder %s1586_s13, %s1582_s12 }
   0xa   : > { %s1955_s20 = smov (%p33_p0, %s31_s20), 0  ;;  %p99_p5 = scmp.eq.s32.totalorder %s1161_s18, 0 }
   0xb   : > { %p1671_p4 = por %p93_p2, %p92_p1  ;;  %s82_s23 = ssub.s32 %s1598_s16, %s1955_s20 }
   0xc   : > { %p124_p6 = scmp.eq.s32.totalorder %s1161_s18, 1  ;;  %p83_p7 = scmp.eq.s32.totalorder %s82_s23, 0 }
   0xd   : > { %p1677_p8 = por %p99_p5, %p98_p3  ;;  %p130_p10 = scmp.eq.s32.totalorder %s1162_s19, 1 }
   0xe   : > { %p1681_p9 = por %p124_p6, %p92_p1  ;;  %p1436_p13 = scmp.lt.s32.totalorder %s1602_s17, 2 }
   0xf   : > { %s1686_s26 = scalar_select %p83_p7, %s1590_s14, %s85_s21  }
  0x10   : > { %s1942_s25 = scalar_select %p1681_p9, 1, 0 }
  0x11   : > { %p1688_p11 = por %p130_p10, %p98_p3  ;;  %s162_s28 = sand.u32 1, %s1590_s14  }
  0x12   : > { %s1419_s29 = smul.u32 48, %s162_s28  ;;  %p1698_p0 = pnand %p1436_p13, %p1671_p4 }
  0x13   : > { %s1943_s27 = scalar_select %p1688_p11, 1, 0 }
  0x14   : > { %s1420_s30 = smul.u32 768, %s1598_s16  ;;  %s166_s8 = scalar_lea.vmem [#allocation2], %s1419_s29 }
  0x15   : > { %s173_s9 = sshll.u32 %s166_s8, 4  ;;  %s1710_s10 = scalar_lea.sflag [#allocation3], %s162_s28  ;;  %s1707_s9 = int_to_ptr.vmem [resolvable:$true] %s173_s9 }
  0x16   : > { %s1705_s7 = scalar_lea.hbm %s1937_s2, %s1420_s30  ;;  %p1492_p3 = pneg %p1698_p0 }
  0x17   : > { %s1490_s11 = scalar_lea.hbm %s1705_s7, 768  ;;  %s1495_s21 = scalar_lea.hbm %s1937_s2, 1536 }
  0x18   : > { %p1491_p2 = scmp.ne.s32.totalorder %s1705_s7, %s1490_s11  ;;  %p1496_p6 = scmp.lt.u32.totalorder %s1705_s7, %s1937_s2 }
  0x19   : > { %p1497_p7 = scmp.lt.u32.totalorder %s1495_s21, %s1490_s11  ;;  %p1499_p13 = scmp.lt.u32.totalorder %s1490_s11, %s1705_s7 }
  0x1a   : > { %p1493_p4 = pnand %p1492_p3, %p1491_p2 }
  0x1b   : > { %p1498_p10 = por %p1497_p7, %p1496_p6 }
  0x1c   : > { %p1494_p5 = pneg %p1493_p4 }
  0x1d   : > { %p1500_p12 = por %p1499_p13, %p1498_p10 }
  0x1f   : > { %p1501_p1 = pnand %p1500_p12, %p1494_p5 }
  0x21   : > { %1504 = shalt.err (!%p1501_p1)
}
  0x22   : > { %s1505_s28 = scalar_lea.vmem %s1707_s9, 768  ;;  %s1604_s29 = smov [#allocation2]  }
  0x23   : > { %p1506_p2 = scmp.ne.s32.totalorder %s1707_s9, %s1505_s28  ;;  %s1510_s30 = sshll.u32 %s1604_s29, 4  ;;  %s1511_s30 = int_to_ptr.vmem [resolvable:$false] %s1510_s30 }
  0x24   : > { %s1512_s5 = scalar_lea.vmem %s1511_s30, 1536  ;;  %p1513_p9 = scmp.lt.s32.totalorder %s1707_s9, %s1511_s30 }
  0x25   : > { %p1508_p4 = pnand %p1506_p2, %p1492_p3  ;;  %p1514_p6 = scmp.lt.s32.totalorder %s1512_s5, %s1505_s28 }
  0x27   : > { %p1509_p11 = pneg %p1508_p4  ;;  %p1515_p7 = por %p1514_p6, %p1513_p9 }
  0x29   : > { %p1516_p10 = pnand %p1515_p7, %p1509_p11 }
  0x2b   : > { %1519 = shalt.err (!%p1516_p10)
}
  0x2c   : > { %s1605_s6 = smov 128   ;;  %s1606_s8 = smov 8  }
  0x2d   : > { %1431 = dma.hbm_to_vmem [thread:$0]  (!%p1698_p0), %s1705_s7, 768, %s1707_s9, %s1710_s10, %s1605_s6, %s1605_s6, %s1606_s8  }
  0x2e   : > { %p181_p12 = scmp.lt.s32.totalorder %s1602_s17, 3  ;;  %p1945_p1 = scmp.ge.s32.totalorder %s1602_s17, 1 }
  0x30   : > { %p182_p3 = pnand %p1945_p1, %p181_p12 }
  0x31   : > { %s1742_s11 = sand.u32 (!%p182_p3), 1, %s1586_s13  }
  0x32   : > { %185 = sbr.rel (%p182_p3) target bundleno = 555 (0x22b), region = 32  ;;  %s188_s19 = scalar_lea.sflag (!%p182_p3), [#allocation3], %s1742_s11 }
  0x33   : > { %s1421_s18 = smul.u32 (!%p182_p3), 48, %s1742_s11 }
  0x35   : > { %s191_s21 = scalar_lea.vmem (!%p182_p3), [#allocation2], %s1421_s18 }
  0x39   : > { %1573 = dma.done.wait (%p1677_p8), %s188_s19, 768  }
  0x3a   : > { %1575 = vsyncadd (%p1677_p8), %s188_s19, 4294966528  ;;  %vm238_vm0 = vcmask 130048   ;;  %v236_v0 = vld [vmem:[%s191_s21] sm:$0xff]  ;;  %v237_v1 = vld [vmem:[%s191_s21 + $0x8] sm:$0xff]  ;;  %s1422_s24 = smul.u32 192, %s1742_s11  ;;  %vm513_vm1 = vcmask 523264  }
  0x3b   : > { %v226_v2 = vld [vmem:[%s1935_s0] sm:$0xff]  ;;  %v1395_v3 = vpack.c.bf16 %v237_v1, %v236_v0  ;;  %v1185_v5 = vld [vmem:[%s191_s21 + $0x18] sm:$0xff]  ;;  %v1211_v9 = vld [vmem:[%s191_s21 + $0x28] sm:$0xff]  ;;  %s1423_s23 = smul.u32 3072, %s1594_s15  ;;  %s1047_s15 = scalar_lea.sflag [#allocation4], %s1742_s11 }
  0x3c   : > { %1303 = vmatprep.mubr.msk.f32.mxu0 %vm238_vm0, %v226_v2  ;;  %v1184_v4 = vld [vmem:[%s191_s21 + $0x10] sm:$0xff]  ;;  %v227_v7 = vld [vmem:[%s1935_s0 + $0x8] sm:$0xff]  ;;  %v1210_v8 = vld [vmem:[%s191_s21 + $0x20] sm:$0xff]  ;;  %s1829_s22 = scalar_lea.vmem [#allocation5], %s1422_s24  ;;  %p1946_p9 = scmp.ne.s32.totalorder %s1942_s25, 0 }
  0x3d   : > { %v1403_v6 = vpack.c.bf16 %v1185_v5, %v1184_v4  ;;  %1396 = vmatprep.subr.bf16.mxu0 %v1395_v3  ;;  %v234_v10 = vld [vmem:[%s1936_s1] sm:$0xff]  ;;  %v228_v11 = vld [vmem:[%s1935_s0 + $0x10] sm:$0xff]  ;;  %v1411_v12 = vpack.c.bf16 %v1211_v9, %v1210_v8  ;;  %v235_v13 = vld [vmem:[%s1936_s1 + $0x8] sm:$0xff]  ;;  %s1062_s28 = sshll.u32 %s1829_s22, 4  ;;  %s1880_s5 = scalar_lea.hbm %s1938_s3, %s1423_s23  ;;  %s1882_s28 = int_to_ptr.vmem [resolvable:$true] %s1062_s28 }
  0x3e   : > { %1398 = vmatpush3.bf16.msra.mxu0 %v1395_v3  ;;  %v1399_v14 = vpack.c.bf16 %v235_v13, %v234_v10  ;;  %v229_v15 = vld [vmem:[%s1935_s0 + $0x18] sm:$0xff]  ;;  %v230_v16 = vld [vmem:[%s1935_s0 + $0x20] sm:$0xff]  ;;  %v231_v17 = vld [vmem:[%s1935_s0 + $0x28] sm:$0xff]  ;;  %s1520_s6 = scalar_lea.vmem %s1882_s28, 3072  ;;  %s1607_s8 = smov [#allocation5]  }
  0x3f   : > { %1404 = vmatprep.subr.bf16.mxu0 %v1403_v6  ;;  %v232_v18 = vld [vmem:[%s1935_s0 + $0x30] sm:$0xff]  ;;  %v233_v19 = vld [vmem:[%s1935_s0 + $0x38] sm:$0xff]  ;;  %p1521_p8 = scmp.ne.s32.totalorder %s1882_s28, %s1520_s6  ;;  %s1524_s18 = sshll.u32 %s1607_s8, 4  ;;  %s1525_s18 = int_to_ptr.vmem [resolvable:$false] %s1524_s18 }
  0x40   : > { %1400 = vmatprep.subr.bf16.mxu1 %v1399_v14  ;;  %s1526_s19 = scalar_lea.vmem %s1525_s18, 6144  ;;  %p1527_p5 = scmp.lt.s32.totalorder %s1882_s28, %s1525_s18 }
  0x41   : > { %1304 = vmatmul.mubr.msk.f32.vlgmr.msra.gmra.mrb[0].mxu0 %vm238_vm0, %v227_v7  ;;  %1402 = vmatpush3.bf16.msra.mxu1 %v1399_v14  ;;  %p1522_p11 = pnand %p1521_p8, %p1946_p9  ;;  %p1528_p13 = scmp.lt.s32.totalorder %s1526_s19, %s1520_s6 }
  0x42   : > { %1406 = vmatpush3.bf16.msra.mxu0 %v1403_v6  ;;  %1306 = vmatprep.mubr.msk.f32.mxu0 %vm238_vm0, %v228_v11 }
  0x43   : > { %1412 = vmatprep.subr.bf16.mxu0 %v1411_v12  ;;  %1408 = vmatprep.subr.bf16.mxu1 %v1399_v14  ;;  %p1523_p0 = pneg %p1522_p11  ;;  %p1529_p2 = por %p1528_p13, %p1527_p5 }
  0x45   : > { %1307 = vmatmul.mubr.msk.f32.gmra.mrb[2].mxu0 %vm238_vm0, %v229_v15  ;;  %p1530_p4 = pnand %p1529_p2, %p1523_p0 }
  0x46   : > { %1309 = vmatprep.mubr.msk.f32.mxu0 %vm238_vm0, %v230_v16 }
  0x49   : > { %1310 = vmatmul.mubr.msk.f32.gmra.mrb[4].mxu0 %vm238_vm0, %v231_v17 }
  0x4a   : > { %1312 = vmatprep.mubr.msk.f32.mxu0 %vm238_vm0, %v232_v18 }
  0x4d   : > { %1313 = vmatmul.mubr.msk.f32.gmra.mrb[6].mxu0 %vm238_vm0, %v233_v19 }
  0x4e   : > { %1335 = vmatprep.mubr.msk.f32.mxu0 %vm238_vm0, %v226_v2 }
  0x51   : > { %1336 = vmatmul.mubr.msk.f32.vlgmr.msra.gmra.mrb[8].mxu0 %vm238_vm0, %v227_v7 }
  0x52   : > { %1414 = vmatpush3.bf16.msra.mxu0 %v1411_v12  ;;  %1338 = vmatprep.mubr.msk.f32.mxu0 %vm238_vm0, %v228_v11 }
  0x55   : > { %1339 = vmatmul.mubr.msk.f32.gmra.mrb[10].mxu0 %vm238_vm0, %v229_v15 }
  0x56   : > { %1341 = vmatprep.mubr.msk.f32.mxu0 %vm238_vm0, %v230_v16 }
  0x59   : > { %1342 = vmatmul.mubr.msk.f32.gmra.mrb[12].mxu0 %vm238_vm0, %v231_v17 }
  0x5a   : > { %1344 = vmatprep.mubr.msk.f32.mxu0 %vm238_vm0, %v232_v18 }
  0x5d   : > { %1345 = vmatmul.mubr.msk.f32.gmra.mrb[14].mxu0 %vm238_vm0, %v233_v19 }
  0x5e   : > { %1367 = vmatprep.mubr.msk.f32.mxu0 %vm238_vm0, %v226_v2 }
  0x61   : > { %1368 = vmatmul.mubr.msk.f32.vlgmr.msra.gmra.mrb[16].mxu0 %vm238_vm0, %v227_v7 }
  0x62   : > { %1370 = vmatprep.mubr.msk.f32.mxu0 %vm238_vm0, %v228_v11 }
  0x65   : > { %1371 = vmatmul.mubr.msk.f32.gmra.mrb[18].mxu0 %vm238_vm0, %v229_v15 }
  0x66   : > { %1373 = vmatprep.mubr.msk.f32.mxu0 %vm238_vm0, %v230_v16 }
  0x69   : > { %1374 = vmatmul.mubr.msk.f32.gmra.mrb[20].mxu0 %vm238_vm0, %v231_v17 }
  0x6a   : > { %1376 = vmatprep.mubr.msk.f32.mxu0 %vm238_vm0, %v232_v18 }
  0x6d   : > { %1377 = vmatmul.mubr.msk.f32.gmra.mrb[22].mxu0 %vm238_vm0, %v233_v19 }
 0x114   : > { %v1305_v20 = vpop.f32.mrb[0].mxu0 }
 0x115   : > { %v329_v21 = vpop.f32.mrb[1].mxu0 }
 0x116   : > { %1319 = vmatprep.mubr.msk.f32.mxu1 %vm238_vm0, %v329_v21 }
 0x117   : > { %1320 = vmatmul.mubr.msk.f32.vlgmr.msra.gmra.mrb[0].mxu1 %vm238_vm0, %v1305_v20 }
 0x118   : > { %v1308_v22 = vpop.f32.mrb[2].mxu0  ;;  %1410 = vmatpush3.bf16.msra.mxu1 %v1399_v14 }
 0x119   : > { %v339_v23 = vpop.f32.mrb[3].mxu0  ;;  %1416 = vmatprep.subr.bf16.mxu1 %v1399_v14 }
 0x11a   : > { %1322 = vmatprep.mubr.msk.f32.mxu1 %vm238_vm0, %v339_v23 }
 0x11b   : > { %1323 = vmatmul.mubr.msk.f32.gmra.mrb[2].mxu1 %vm238_vm0, %v1308_v22 }
 0x11c   : > { %v1311_v24 = vpop.f32.mrb[4].mxu0 }
 0x11d   : > { %v349_v25 = vpop.f32.mrb[5].mxu0 }
 0x11e   : > { %1325 = vmatprep.mubr.msk.f32.mxu1 %vm238_vm0, %v349_v25 }
 0x11f   : > { %1326 = vmatmul.mubr.msk.f32.gmra.mrb[4].mxu1 %vm238_vm0, %v1311_v24 }
 0x120   : > { %v1314_v26 = vpop.f32.mrb[6].mxu0 }
 0x121   : > { %v359_v27 = vpop.f32.mrb[7].mxu0 }
 0x122   : > { %1328 = vmatprep.mubr.msk.f32.mxu1 %vm238_vm0, %v359_v27 }
 0x123   : > { %1329 = vmatmul.mubr.msk.f32.gmra.mrb[6].mxu1 %vm238_vm0, %v1314_v26 }
 0x124   : > { %v1337_v28 = vpop.f32.mrb[8].mxu0 }
 0x125   : > { %v591_v29 = vpop.f32.mrb[9].mxu0 }
 0x126   : > { %1351 = vmatprep.mubr.msk.f32.mxu1 %vm238_vm0, %v591_v29 }
 0x127   : > { %1352 = vmatmul.mubr.msk.f32.vlgmr.msra.gmra.mrb[8].mxu1 %vm238_vm0, %v1337_v28 }
 0x128   : > { %v1340_v30 = vpop.f32.mrb[10].mxu0  ;;  %1418 = vmatpush3.bf16.msra.mxu1 %v1399_v14 }
 0x129   : > { %v601_v31 = vpop.f32.mrb[11].mxu0 }
 0x12a   : > { %1354 = vmatprep.mubr.msk.f32.mxu1 %vm238_vm0, %v601_v31 }
 0x12b   : > { %1355 = vmatmul.mubr.msk.f32.gmra.mrb[10].mxu1 %vm238_vm0, %v1340_v30 }
 0x12c   : > { %v1343_v32 = vpop.f32.mrb[12].mxu0 }
 0x12d   : > { %v611_v33 = vpop.f32.mrb[13].mxu0 }
 0x12e   : > { %1357 = vmatprep.mubr.msk.f32.mxu1 %vm238_vm0, %v611_v33 }
 0x12f   : > { %1358 = vmatmul.mubr.msk.f32.gmra.mrb[12].mxu1 %vm238_vm0, %v1343_v32 }
 0x130   : > { %v1346_v34 = vpop.f32.mrb[14].mxu0 }
 0x131   : > { %v621_v35 = vpop.f32.mrb[15].mxu0 }
 0x132   : > { %1360 = vmatprep.mubr.msk.f32.mxu1 %vm238_vm0, %v621_v35 }
 0x133   : > { %1361 = vmatmul.mubr.msk.f32.gmra.mrb[14].mxu1 %vm238_vm0, %v1346_v34 }
 0x134   : > { %v1369_v36 = vpop.f32.mrb[16].mxu0 }
 0x135   : > { %v853_v37 = vpop.f32.mrb[17].mxu0 }
 0x136   : > { %1383 = vmatprep.mubr.msk.f32.mxu1 %vm238_vm0, %v853_v37 }
 0x137   : > { %1384 = vmatmul.mubr.msk.f32.vlgmr.msra.gmra.mrb[16].mxu1 %vm238_vm0, %v1369_v36 }
 0x138   : > { %v1372_v38 = vpop.f32.mrb[18].mxu0 }
 0x139   : > { %v863_v39 = vpop.f32.mrb[19].mxu0 }
 0x13a   : > { %1386 = vmatprep.mubr.msk.f32.mxu1 %vm238_vm0, %v863_v39 }
 0x13b   : > { %1387 = vmatmul.mubr.msk.f32.gmra.mrb[18].mxu1 %vm238_vm0, %v1372_v38 }
 0x13c   : > { %v1375_v40 = vpop.f32.mrb[20].mxu0 }
 0x13d   : > { %v873_v41 = vpop.f32.mrb[21].mxu0 }
 0x13e   : > { %1389 = vmatprep.mubr.msk.f32.mxu1 %vm238_vm0, %v873_v41 }
 0x13f   : > { %1390 = vmatmul.mubr.msk.f32.gmra.mrb[20].mxu1 %vm238_vm0, %v1375_v40 }
 0x140   : > { %v1378_v42 = vpop.f32.mrb[22].mxu0 }
 0x141   : > { %v883_v43 = vpop.f32.mrb[23].mxu0 }
 0x142   : > { %1392 = vmatprep.mubr.msk.f32.mxu1 %vm238_vm0, %v883_v43 }
 0x143   : > { %1393 = vmatmul.mubr.msk.f32.gmra.mrb[22].mxu1 %vm238_vm0, %v1378_v42 }
 0x1ea   : > { %v1321_v44 = vpop.f32.mrb[0].mxu1 }
 0x1eb   : > { %v498_v45 = vmax.f32 %v1321_v44, 0.0  ;;  %v458_v46 = vpop.f32.mrb[1].mxu1 }
 0x1ec   : > { %v497_v47 = vmax.f32 %v458_v46, 0.0 }
 0x1ed   : > { %v506_v48 = vmin.f32 %v498_v45, 1.0 }
 0x1ee   : > { %v505_v49 = vmin.f32 %v497_v47, 1.0  ;;  %v1324_v50 = vpop.f32.mrb[2].mxu1 }
 0x1ef   : > { %515 = vst.msk [vmem:[%s1829_s22 + $0x8] sm:$0xff] %vm513_vm1, %v506_v48  ;;  %v500_v51 = vmax.f32 %v1324_v50, 0.0  ;;  %v468_v52 = vpop.f32.mrb[3].mxu1 }
 0x1f0   : > { %514 = vst.msk [vmem:[%s1829_s22] sm:$0xff] %vm513_vm1, %v505_v49  ;;  %v499_v53 = vmax.f32 %v468_v52, 0.0 }
 0x1f1   : > { %v508_v54 = vmin.f32 %v500_v51, 1.0 }
 0x1f2   : > { %v507_v55 = vmin.f32 %v499_v53, 1.0  ;;  %v1327_v56 = vpop.f32.mrb[4].mxu1 }
 0x1f3   : > { %517 = vst.msk [vmem:[%s1829_s22 + $0x18] sm:$0xff] %vm513_vm1, %v508_v54  ;;  %v502_v57 = vmax.f32 %v1327_v56, 0.0  ;;  %v478_v58 = vpop.f32.mrb[5].mxu1 }
 0x1f4   : > { %516 = vst.msk [vmem:[%s1829_s22 + $0x10] sm:$0xff] %vm513_vm1, %v507_v55  ;;  %v501_v59 = vmax.f32 %v478_v58, 0.0 }
 0x1f5   : > { %v510_v60 = vmin.f32 %v502_v57, 1.0 }
 0x1f6   : > { %v509_v61 = vmin.f32 %v501_v59, 1.0  ;;  %v1330_v62 = vpop.f32.mrb[6].mxu1 }
 0x1f7   : > { %519 = vst.msk [vmem:[%s1829_s22 + $0x28] sm:$0xff] %vm513_vm1, %v510_v60  ;;  %v504_v63 = vmax.f32 %v1330_v62, 0.0  ;;  %v488_v0 = vpop.f32.mrb[7].mxu1 }
 0x1f8   : > { %518 = vst.msk [vmem:[%s1829_s22 + $0x20] sm:$0xff] %vm513_vm1, %v509_v61  ;;  %v503_v1 = vmax.f32 %v488_v0, 0.0 }
 0x1f9   : > { %v512_v2 = vmin.f32 %v504_v63, 1.0 }
 0x1fa   : > { %v511_v3 = vmin.f32 %v503_v1, 1.0  ;;  %v1353_v4 = vpop.f32.mrb[8].mxu1 }
 0x1fb   : > { %521 = vst.msk [vmem:[%s1829_s22 + $0x38] sm:$0xff] %vm513_vm1, %v512_v2  ;;  %v760_v5 = vmax.f32 %v1353_v4, 0.0  ;;  %v720_v6 = vpop.f32.mrb[9].mxu1 }
 0x1fc   : > { %520 = vst.msk [vmem:[%s1829_s22 + $0x30] sm:$0xff] %vm513_vm1, %v511_v3  ;;  %v759_v7 = vmax.f32 %v720_v6, 0.0 }
 0x1fd   : > { %v768_v8 = vmin.f32 %v760_v5, 1.0 }
 0x1fe   : > { %v767_v9 = vmin.f32 %v759_v7, 1.0  ;;  %v1356_v10 = vpop.f32.mrb[10].mxu1 }
 0x1ff   : > { %1203 = vst.msk [vmem:[%s1829_s22 + $0x48] sm:$0xff] %vm513_vm1, %v768_v8  ;;  %v762_v11 = vmax.f32 %v1356_v10, 0.0  ;;  %v730_v12 = vpop.f32.mrb[11].mxu1 }
 0x200   : > { %1202 = vst.msk [vmem:[%s1829_s22 + $0x40] sm:$0xff] %vm513_vm1, %v767_v9  ;;  %v761_v13 = vmax.f32 %v730_v12, 0.0 }
 0x201   : > { %v770_v14 = vmin.f32 %v762_v11, 1.0 }
 0x202   : > { %v769_v15 = vmin.f32 %v761_v13, 1.0  ;;  %v1359_v16 = vpop.f32.mrb[12].mxu1 }
 0x203   : > { %1205 = vst.msk [vmem:[%s1829_s22 + $0x58] sm:$0xff] %vm513_vm1, %v770_v14  ;;  %v764_v17 = vmax.f32 %v1359_v16, 0.0  ;;  %v740_v18 = vpop.f32.mrb[13].mxu1 }
 0x204   : > { %1204 = vst.msk [vmem:[%s1829_s22 + $0x50] sm:$0xff] %vm513_vm1, %v769_v15  ;;  %v763_v19 = vmax.f32 %v740_v18, 0.0 }
 0x205   : > { %v772_v20 = vmin.f32 %v764_v17, 1.0 }
 0x206   : > { %v771_v21 = vmin.f32 %v763_v19, 1.0  ;;  %v1362_v22 = vpop.f32.mrb[14].mxu1 }
 0x207   : > { %1207 = vst.msk [vmem:[%s1829_s22 + $0x68] sm:$0xff] %vm513_vm1, %v772_v20  ;;  %v766_v23 = vmax.f32 %v1362_v22, 0.0  ;;  %v750_v24 = vpop.f32.mrb[15].mxu1 }
 0x208   : > { %1206 = vst.msk [vmem:[%s1829_s22 + $0x60] sm:$0xff] %vm513_vm1, %v771_v21  ;;  %v765_v25 = vmax.f32 %v750_v24, 0.0 }
 0x209   : > { %v774_v26 = vmin.f32 %v766_v23, 1.0 }
 0x20a   : > { %v773_v27 = vmin.f32 %v765_v25, 1.0  ;;  %v1385_v28 = vpop.f32.mrb[16].mxu1 }
 0x20b   : > { %1209 = vst.msk [vmem:[%s1829_s22 + $0x78] sm:$0xff] %vm513_vm1, %v774_v26  ;;  %v1022_v29 = vmax.f32 %v1385_v28, 0.0  ;;  %v982_v30 = vpop.f32.mrb[17].mxu1 }
 0x20c   : > { %1208 = vst.msk [vmem:[%s1829_s22 + $0x70] sm:$0xff] %vm513_vm1, %v773_v27  ;;  %v1021_v31 = vmax.f32 %v982_v30, 0.0 }
 0x20d   : > { %v1030_v32 = vmin.f32 %v1022_v29, 1.0 }
 0x20e   : > { %v1029_v33 = vmin.f32 %v1021_v31, 1.0  ;;  %v1388_v34 = vpop.f32.mrb[18].mxu1 }
 0x20f   : > { %1229 = vst.msk [vmem:[%s1829_s22 + $0x88] sm:$0xff] %vm513_vm1, %v1030_v32  ;;  %v1024_v35 = vmax.f32 %v1388_v34, 0.0  ;;  %v992_v36 = vpop.f32.mrb[19].mxu1 }
 0x210   : > { %1228 = vst.msk [vmem:[%s1829_s22 + $0x80] sm:$0xff] %vm513_vm1, %v1029_v33  ;;  %v1023_v37 = vmax.f32 %v992_v36, 0.0 }
 0x211   : > { %v1032_v38 = vmin.f32 %v1024_v35, 1.0 }
 0x212   : > { %v1031_v39 = vmin.f32 %v1023_v37, 1.0  ;;  %v1391_v40 = vpop.f32.mrb[20].mxu1 }
 0x213   : > { %1231 = vst.msk [vmem:[%s1829_s22 + $0x98] sm:$0xff] %vm513_vm1, %v1032_v38  ;;  %v1026_v41 = vmax.f32 %v1391_v40, 0.0  ;;  %v1002_v42 = vpop.f32.mrb[21].mxu1 }
 0x214   : > { %1230 = vst.msk [vmem:[%s1829_s22 + $0x90] sm:$0xff] %vm513_vm1, %v1031_v39  ;;  %v1025_v43 = vmax.f32 %v1002_v42, 0.0 }
 0x215   : > { %v1034_v44 = vmin.f32 %v1026_v41, 1.0 }
 0x216   : > { %v1033_v45 = vmin.f32 %v1025_v43, 1.0  ;;  %v1394_v46 = vpop.f32.mrb[22].mxu1 }
 0x217   : > { %1233 = vst.msk [vmem:[%s1829_s22 + $0xa8] sm:$0xff] %vm513_vm1, %v1034_v44  ;;  %v1028_v47 = vmax.f32 %v1394_v46, 0.0  ;;  %v1012_v48 = vpop.f32.mrb[23].mxu1 }
 0x218   : > { %1232 = vst.msk [vmem:[%s1829_s22 + $0xa0] sm:$0xff] %vm513_vm1, %v1033_v45  ;;  %v1027_v49 = vmax.f32 %v1012_v48, 0.0 }
 0x219   : > { %v1036_v50 = vmin.f32 %v1028_v47, 1.0 }
 0x21a   : > { %v1035_v51 = vmin.f32 %v1027_v49, 1.0 }
 0x21b   : > { %1235 = vst.msk [vmem:[%s1829_s22 + $0xb8] sm:$0xff] %vm513_vm1, %v1036_v50 }
 0x21c   : > { %1234 = vst.msk [vmem:[%s1829_s22 + $0xb0] sm:$0xff] %vm513_vm1, %v1035_v51 }
 0x21d   : > { %1533 = shalt.err (!%p1530_p4)
}
 0x21e   : > { %s1534_s21 = scalar_lea.hbm %s1880_s5, 3072  ;;  %s1538_s9 = scalar_lea.hbm %s1938_s3, 6144 }
 0x21f   : > { %p1535_p6 = scmp.ne.s32.totalorder %s1880_s5, %s1534_s21  ;;  %p1539_p12 = scmp.lt.u32.totalorder %s1880_s5, %s1938_s3 }
 0x220   : > { %p1540_p1 = scmp.lt.u32.totalorder %s1538_s9, %s1534_s21  ;;  %p1542_p8 = scmp.lt.u32.totalorder %s1534_s21, %s1880_s5 }
 0x221   : > { %p1536_p7 = pnand %p1535_p6, %p1946_p9 }
 0x222   : > { %p1541_p3 = por %p1540_p1, %p1539_p12 }
 0x223   : > { %p1537_p10 = pneg %p1536_p7 }
 0x224   : > { %p1543_p11 = por %p1542_p8, %p1541_p3 }
 0x226   : > { %p1544_p0 = pnand %p1543_p11, %p1537_p10 }
 0x228   : > { %1547 = shalt.err (!%p1544_p0)
}
 0x229   : > { %s1608_s22 = smov 128   ;;  %s1609_s23 = smov 8  }
 0x22a   : > { %1426 = dma.vmem_to_hbm [thread:$0]  (%p1946_p9), %s1882_s28, 3072, %s1880_s5, %s1047_s15, %s1608_s22, %s1608_s22, %s1609_s23  }
 0x22b PF: > { %s1077_s29 = sand.u32 1, %s1582_s12   ;;  %p1947_p5 = scmp.ne.s32.totalorder %s1943_s27, 0 }
 0x22c   : > { %p1948_p13 = scmp.ge.s32.totalorder %s1602_s17, 2  ;;  %s1078_s30 = scalar_lea.sflag [#allocation4], %s1077_s29 }
 0x22e   : > { %p1433_p2 = pnand %p1948_p13, %p1947_p5 }
 0x230   : > { %1577 = dma.done.wait (!%p1433_p2), %s1078_s30, 3072  }
 0x231   : > { %1579 = vsyncadd (!%p1433_p2), %s1078_s30, 4294964224  ;;  %s19_s17 = sadd.s32 1, %s1602_s17   ;;  %s1949_s12 = smov %s1586_s13 }
 0x232   : > { %p16_p4 = scmp.ge.s32.totalorder %s19_s17, 4   ;;  %s1950_s13 = smov %s1590_s14 }
 0x233   : > { %s1951_s14 = smov %s1686_s26  ;;  %s1952_s15 = smov %s1598_s16 }
 0x234   : > { %s1953_s16 = smov %s1955_s20  ;;  %18 = sbr.rel (!%p16_p4) target bundleno = 6 (0x6), region = 84 }
 0x23b   :  { %1083 = vsyncpa [#allocation3], 1 }
 0x23c   :  { %1085 = vsyncpa [#allocation3 + $0x1], 1 }
 0x23d   :  { %1086 = vsyncpa [#allocation4], 1 }
 0x23e   :  { %1088 = vsyncpa [#allocation4 + $0x1], 1 }

</bundles_post_ra>
